<compile_context>
chip_gen: v7x
topology: tpu7x:2x2x1
jax: 0.10.0
libtpu: 0.0.40
codegen_flags: <defaults>
</compile_context>

<pallas_src>
import functools

import jax
import jax.numpy as jnp
from jax.experimental import pallas as pl
from jax.experimental.pallas import tpu as pltpu

HIDDEN = 512  # fixed by the PyTorch module


def _round_up(n, m):
    return ((n + m - 1) // m) * m


# ----------------------------------------------------------------------------
# Kernel
# ----------------------------------------------------------------------------
def _cvae_kernel(
    x_ref, y_ref, eps_ref,                            # per-batch-block inputs
    w1x_ref, w1y_ref, b1_ref, wmulv_ref, bmulv_ref,   # resident encoder weights
    w3z_ref, w3y_ref, b3_ref, w4_ref, b4_ref,         # resident decoder weights
    recon_ref, mulv_ref,                              # outputs
):
    f32, bf16 = jnp.float32, jnp.bfloat16
    L = eps_ref.shape[-1]
    tb = x_ref.shape[0]
    C = w1y_ref.shape[0]

    # One-hot(y) built in-register: no HBM traffic for the class branch.
    cls = jax.lax.broadcasted_iota(jnp.int32, (tb, C), 1)
    oh = (cls == y_ref[...]).astype(bf16)             # (tb, C), exact 0/1

    # encoder: h1 = relu([x | onehot(y)] @ W1^T + b1), concat split into 2 dots
    h1 = (
        jnp.dot(x_ref[...], w1x_ref[...], preferred_element_type=f32)
        + jnp.dot(oh, w1y_ref[...], preferred_element_type=f32)
        + b1_ref[...]
    )
    h1 = jnp.maximum(h1, 0.0)

    # fused mu/logvar head: one (512, 2L) matmul instead of two (512, L)
    mulv = (
        jnp.dot(h1.astype(bf16), wmulv_ref[...], preferred_element_type=f32)
        + bmulv_ref[...]
    )
    mu = mulv[:, :L]
    logvar = mulv[:, L:]

    # reparameterization (f32 elementwise, exp on the EUP)
    z = mu + eps_ref[...] * jnp.exp(0.5 * logvar)

    # decoder: h3 = relu([z | onehot(y)] @ W3^T + b3)
    h3 = (
        jnp.dot(z.astype(bf16), w3z_ref[...], preferred_element_type=f32)
        + jnp.dot(oh, w3y_ref[...], preferred_element_type=f32)
        + b3_ref[...]
    )
    h3 = jnp.maximum(h3, 0.0)

    logits = (
        jnp.dot(h3.astype(bf16), w4_ref[...], preferred_element_type=f32)
        + b4_ref[...]
    )
    # sigmoid with the divide moved onto the EUP slot
    recon_ref[...] = pl.reciprocal(1.0 + jnp.exp(-logits), approx=True)
    mulv_ref[...] = mulv


# ----------------------------------------------------------------------------
# Wrapper
# ----------------------------------------------------------------------------
@functools.partial(
    jax.jit,
    static_argnames=("input_dim", "latent_dim", "num_classes", "block_batch"),
)
def cvae_forward(x, y, eps, kp, *, input_dim, latent_dim, num_classes,
                 block_batch=256):
    """Fused CVAE forward. `kp` must be the pre-packed kernel params.

    Returns (recon_x, mu, logvar), matching the PyTorch module semantics.
    """
    x = x.reshape(-1, input_dim)                       # x.view(-1, input_dim)
    B = x.shape[0]

    tb = _round_up(min(block_batch, _round_up(B, 8)), 8)
    Bp = _round_up(B, tb)
    pad = Bp - B

    x = x.astype(jnp.bfloat16)                         # halve activation DMA bytes
    eps = eps.astype(jnp.float32)
    y2 = y.reshape(-1, 1).astype(jnp.int32)

    if pad:
        x = jnp.pad(x, ((0, pad), (0, 0)))
        eps = jnp.pad(eps, ((0, pad), (0, 0)))
        y2 = jnp.pad(y2, ((0, pad), (0, 0)))           # pad rows use class 0

    H = kp["w1x"].shape[1]
    L2 = 2 * latent_dim
    C = num_classes

    def batch_spec(cols):
        return pl.BlockSpec((tb, cols), lambda i: (i, 0))

    def fixed_spec(shp):
        return pl.BlockSpec(shp, lambda i: (0, 0))     # stays VMEM-resident

    recon, mulv = pl.pallas_call(
        _cvae_kernel,
        grid=(Bp // tb,),
        in_specs=[
            batch_spec(input_dim),            # x (bf16)
            batch_spec(1),                    # y (int32)
            batch_spec(latent_dim),           # eps (f32)
            fixed_spec((input_dim, H)),       # W1x (bf16)
            fixed_spec((C, H)),               # W1y (bf16)
            fixed_spec((1, H)),               # b1
            fixed_spec((H, L2)),              # [W21 | W22] (bf16)
            fixed_spec((1, L2)),              # [b21 | b22]
            fixed_spec((latent_dim, H)),      # W3z (bf16)
            fixed_spec((C, H)),               # W3y (bf16)
            fixed_spec((1, H)),               # b3
            fixed_spec((H, input_dim)),       # W4 (bf16)
            fixed_spec((1, input_dim)),       # b4
        ],
        out_specs=(batch_spec(input_dim), batch_spec(L2)),
        out_shape=(
            jax.ShapeDtypeStruct((Bp, input_dim), jnp.float32),
            jax.ShapeDtypeStruct((Bp, L2), jnp.float32),
        ),
        compiler_params=pltpu.CompilerParams(dimension_semantics=("parallel",)),
    )(
        x, y2, eps,
        kp["w1x"], kp["w1y"], kp["b1"][None, :], kp["wmulv"], kp["bmulv"][None, :],
        kp["w3z"], kp["w3y"], kp["b3"][None, :], kp["w4"], kp["b4"][None, :],
    )

    recon = recon[:B]
    mu = mulv[:B, :latent_dim]
    logvar = mulv[:B, latent_dim:]
    return recon, mu, logvar


# ----------------------------------------------------------------------------
# Params: PyTorch-layout init + one-time packing into kernel layout
# ----------------------------------------------------------------------------
def init_torch_params(key, input_dim, latent_dim, num_classes, hidden=HIDDEN):
    """nn.Linear default init (U[-1/sqrt(fan_in), 1/sqrt(fan_in)]), (out, in) layout."""
    def linear(k, out_f, in_f):
        kw, kb = jax.random.split(k)
        bound = 1.0 / jnp.sqrt(jnp.float32(in_f))
        w = jax.random.uniform(kw, (out_f, in_f), jnp.float32, -bound, bound)
        b = jax.random.uniform(kb, (out_f,), jnp.float32, -bound, bound)
        return w, b

    k1, k21, k22, k3, k4 = jax.random.split(key, 5)
    w1, b1 = linear(k1, hidden, input_dim + num_classes)
    w21, b21 = linear(k21, latent_dim, hidden)
    w22, b22 = linear(k22, latent_dim, hidden)
    w3, b3 = linear(k3, hidden, latent_dim + num_classes)
    w4, b4 = linear(k4, input_dim, hidden)
    return dict(w1=w1, b1=b1, w21=w21, b21=b21, w22=w22, b22=b22,
                w3=w3, b3=b3, w4=w4, b4=b4)


def pack_params(tp, input_dim, latent_dim):
    """ONE-TIME conversion to kernel layout: transpose, split concat dims,
    fuse mu/logvar head, cast matmul weights to bf16."""
    w1t = tp["w1"].T                     # (input_dim + num_classes, 512)
    w3t = tp["w3"].T                     # (latent_dim + num_classes, 512)
    return dict(
        w1x=w1t[:input_dim].astype(jnp.bfloat16),
        w1y=w1t[input_dim:].astype(jnp.bfloat16),    # applied via in-kernel one-hot dot
        b1=tp["b1"].astype(jnp.float32),
        wmulv=jnp.concatenate([tp["w21"].T, tp["w22"].T], axis=1).astype(jnp.bfloat16),
        bmulv=jnp.concatenate([tp["b21"], tp["b22"]]).astype(jnp.float32),
        w3z=w3t[:latent_dim].astype(jnp.bfloat16),
        w3y=w3t[latent_dim:].astype(jnp.bfloat16),   # applied via in-kernel one-hot dot
        b3=tp["b3"].astype(jnp.float32),
        w4=tp["w4"].T.astype(jnp.bfloat16),
        b4=tp["b4"].astype(jnp.float32),
    )


# ----------------------------------------------------------------------------
# Pure-JAX references
# ----------------------------------------------------------------------------
def cvae_reference_f32(x, y, eps, tp, *, input_dim, num_classes):
    """Exact PyTorch-module semantics in f32."""
    x = x.reshape(-1, input_dim)
    oh = jax.nn.one_hot(y, num_classes, dtype=jnp.float32)
    xc = jnp.concatenate([x, oh], axis=1)
    h1 = jax.nn.relu(xc @ tp["w1"].T + tp["b1"])
    mu = h1 @ tp["w21"].T + tp["b21"]
    logvar = h1 @ tp["w22"].T + tp["b22"]
    z = mu + eps * jnp.exp(0.5 * logvar)
    zc = jnp.concatenate([z, oh], axis=1)
    h3 = jax.nn.relu(zc @ tp["w3"].T + tp["b3"])
    recon = jax.nn.sigmoid(h3 @ tp["w4"].T + tp["b4"])
    return recon, mu, logvar


def cvae_reference_kernel_math(x, y, eps, kp, *, input_dim, latent_dim):
    """Emulates the kernel's exact bf16/f32 mixed math (with exact sigmoid).

    The in-kernel one-hot dot picks exactly one (bf16) row, so it equals a
    gather of the bf16 class rows promoted to f32.
    """
    bf16, f32 = jnp.bfloat16, jnp.float32
    x = x.reshape(-1, input_dim).astype(bf16)
    b1e = kp["b1"][None, :] + jnp.take(kp["w1y"], y, axis=0).astype(f32)
    b3e = kp["b3"][None, :] + jnp.take(kp["w3y"], y, axis=0).astype(f32)
    h1 = jnp.maximum(jnp.dot(x, kp["w1x"], preferred_element_type=f32) + b1e, 0.0)
    mulv = jnp.dot(h1.astype(bf16), kp["wmulv"], preferred_element_type=f32) + kp["bmulv"][None, :]
    mu, logvar = mulv[:, :latent_dim], mulv[:, latent_dim:]
    z = mu + eps * jnp.exp(0.5 * logvar)
    h3 = jnp.maximum(jnp.dot(z.astype(bf16), kp["w3z"], preferred_element_type=f32) + b3e, 0.0)
    logits = jnp.dot(h3.astype(bf16), kp["w4"], preferred_element_type=f32) + kp["b4"][None, :]
    return jax.nn.sigmoid(logits), mu, logvar


# ----------------------------------------------------------------------------
# Self-test
# ----------------------------------------------------------------------------
if __name__ == "__main__":
    input_dim, latent_dim, num_classes = 64, 16, 8

    key = jax.random.PRNGKey(0)
    kparam, kdata = jax.random.split(key)
    torch_params = init_torch_params(kparam, input_dim, latent_dim, num_classes)
    kernel_params = pack_params(torch_params, input_dim, latent_dim)  # packed ONCE

    # Two configs: tiny single-block (with row padding), and multi-block grid.
    for batch, block_batch in [(2, 256), (19, 8)]:
        kx, ky, keps, kdata = jax.random.split(kdata, 4)
        x = jax.random.normal(kx, (batch, input_dim), jnp.float32)
        y = jax.random.randint(ky, (batch,), 0, num_classes, jnp.int32)
        # eps ~ N(0,1) sampled outside the kernel (torch.randn_like equivalent)
        eps = jax.random.normal(keps, (batch, latent_dim), jnp.float32)

        recon, mu, logvar = cvae_forward(
            x, y, eps, kernel_params,
            input_dim=input_dim, latent_dim=latent_dim, num_classes=num_classes,
            block_batch=block_batch,
        )
        jax.block_until_ready((recon, mu, logvar))

        # Tight check vs pure-JAX emulation of the kernel's bf16 math.
        r_k, mu_k, lv_k = cvae_reference_kernel_math(
            x, y, eps, kernel_params, input_dim=input_dim, latent_dim=latent_dim)
        assert jnp.allclose(mu, mu_k, atol=1e-3, rtol=1e-3)
        assert jnp.allclose(logvar, lv_k, atol=1e-3, rtol=1e-3)
        assert jnp.allclose(recon, r_k, atol=1e-2, rtol=1e-2)  # approx-recip sigmoid

        # Loose check vs full-f32 PyTorch-semantics reference (bf16 MXU inputs).
        r_f, mu_f, lv_f = cvae_reference_f32(
            x, y, eps, torch_params, input_dim=input_dim, num_classes=num_classes)
        assert jnp.allclose(mu, mu_f, atol=5e-2, rtol=5e-2)
        assert jnp.allclose(logvar, lv_f, atol=5e-2, rtol=5e-2)
        assert jnp.allclose(recon, r_f, atol=5e-2, rtol=5e-2)

    print("KERNEL_OK")
</pallas_src>

<mosaic_0001>
module attributes {stable_mosaic.version = 11 : i64} {
  func.func @_cvae_kernel(%arg0: i32, %arg1: memref<8x64xbf16, #tpu.memory_space<vmem>>, %arg2: memref<8x1xi32, #tpu.memory_space<vmem>>, %arg3: memref<8x16xf32, #tpu.memory_space<vmem>>, %arg4: memref<64x512xbf16, #tpu.memory_space<vmem>>, %arg5: memref<8x512xbf16, #tpu.memory_space<vmem>>, %arg6: memref<1x512xf32, #tpu.memory_space<vmem>>, %arg7: memref<512x32xbf16, #tpu.memory_space<vmem>>, %arg8: memref<1x32xf32, #tpu.memory_space<vmem>>, %arg9: memref<16x512xbf16, #tpu.memory_space<vmem>>, %arg10: memref<8x512xbf16, #tpu.memory_space<vmem>>, %arg11: memref<1x512xf32, #tpu.memory_space<vmem>>, %arg12: memref<512x64xbf16, #tpu.memory_space<vmem>>, %arg13: memref<1x64xf32, #tpu.memory_space<vmem>>, %arg14: memref<8x64xf32, #tpu.memory_space<vmem>>, %arg15: memref<8x32xf32, #tpu.memory_space<vmem>>) attributes {dimension_semantics = [#tpu.dimension_semantics<parallel>], iteration_bounds = array<i64: 1>, scalar_prefetch = 0 : i64, scratch_operands = 0 : i64, tpu.core_type = #tpu.core_type<tc>, window_params = [{transform_indices = @transform_0, window_bounds = array<i64: 8, 64>}, {transform_indices = @transform_1, window_bounds = array<i64: 8, 1>}, {transform_indices = @transform_2, window_bounds = array<i64: 8, 16>}, {pipeline_mode = #tpu.pipeline_mode<synchronous>, transform_indices = @transform_3, window_bounds = array<i64: 64, 512>}, {pipeline_mode = #tpu.pipeline_mode<synchronous>, transform_indices = @transform_4, window_bounds = array<i64: 8, 512>}, {pipeline_mode = #tpu.pipeline_mode<synchronous>, transform_indices = @transform_5, window_bounds = array<i64: 1, 512>}, {pipeline_mode = #tpu.pipeline_mode<synchronous>, transform_indices = @transform_6, window_bounds = array<i64: 512, 32>}, {pipeline_mode = #tpu.pipeline_mode<synchronous>, transform_indices = @transform_7, window_bounds = array<i64: 1, 32>}, {pipeline_mode = #tpu.pipeline_mode<synchronous>, transform_indices = @transform_8, window_bounds = array<i64: 16, 512>}, {pipeline_mode = #tpu.pipeline_mode<synchronous>, transform_indices = @transform_9, window_bounds = array<i64: 8, 512>}, {pipeline_mode = #tpu.pipeline_mode<synchronous>, transform_indices = @transform_10, window_bounds = array<i64: 1, 512>}, {pipeline_mode = #tpu.pipeline_mode<synchronous>, transform_indices = @transform_11, window_bounds = array<i64: 512, 64>}, {pipeline_mode = #tpu.pipeline_mode<synchronous>, transform_indices = @transform_12, window_bounds = array<i64: 1, 64>}, {transform_indices = @transform_13, window_bounds = array<i64: 8, 64>}, {transform_indices = @transform_14, window_bounds = array<i64: 8, 32>}]} {
    %0 = tpu.iota {dimensions = array<i32: 1>} : vector<8x8xi32>
    %c0 = arith.constant 0 : index
    %c0_0 = arith.constant 0 : index
    %1 = vector.load %arg2[%c0, %c0_0] : memref<8x1xi32, #tpu.memory_space<vmem>>, vector<8x1xi32>
    %2 = vector.broadcast %1 : vector<8x1xi32> to vector<8x8xi32>
    %3 = arith.cmpi eq, %0, %2 : vector<8x8xi32>
    %4 = arith.extui %3 : vector<8x8xi1> to vector<8x8xi32>
    %5 = arith.sitofp %4 : vector<8x8xi32> to vector<8x8xf32>
    %6 = arith.truncf %5 : vector<8x8xf32> to vector<8x8xbf16>
    %c0_1 = arith.constant 0 : index
    %c0_2 = arith.constant 0 : index
    %7 = vector.load %arg1[%c0_1, %c0_2] : memref<8x64xbf16, #tpu.memory_space<vmem>>, vector<8x64xbf16>
    %c0_3 = arith.constant 0 : index
    %c0_4 = arith.constant 0 : index
    %8 = vector.load %arg4[%c0_3, %c0_4] : memref<64x512xbf16, #tpu.memory_space<vmem>>, vector<64x512xbf16>
    %cst = arith.constant dense<0.000000e+00> : vector<8x512xf32>
    %9 = tpu.matmul %7, %8, %cst {dimension_numbers = #tpu.dot_dimension_numbers<[1], [0], [0], [1], [0, 0, 1, 1], [], []>} : vector<8x64xbf16>, vector<64x512xbf16>, vector<8x512xf32> -> vector<8x512xf32>
    %c0_5 = arith.constant 0 : index
    %c0_6 = arith.constant 0 : index
    %10 = vector.load %arg5[%c0_5, %c0_6] : memref<8x512xbf16, #tpu.memory_space<vmem>>, vector<8x512xbf16>
    %cst_7 = arith.constant dense<0.000000e+00> : vector<8x512xf32>
    %11 = tpu.matmul %6, %10, %cst_7 {dimension_numbers = #tpu.dot_dimension_numbers<[1], [0], [0], [1], [0, 0, 1, 1], [], []>} : vector<8x8xbf16>, vector<8x512xbf16>, vector<8x512xf32> -> vector<8x512xf32>
    %12 = arith.addf %9, %11 : vector<8x512xf32>
    %c0_8 = arith.constant 0 : index
    %c0_9 = arith.constant 0 : index
    %13 = vector.load %arg6[%c0_8, %c0_9] : memref<1x512xf32, #tpu.memory_space<vmem>>, vector<1x512xf32>
    %14 = vector.broadcast %13 : vector<1x512xf32> to vector<8x512xf32>
    %15 = arith.addf %12, %14 : vector<8x512xf32>
    %cst_10 = arith.constant 0.000000e+00 : f32
    %16 = vector.broadcast %cst_10 : f32 to vector<8x512xf32>
    %17 = arith.maximumf %15, %16 : vector<8x512xf32>
    %18 = arith.truncf %17 : vector<8x512xf32> to vector<8x512xbf16>
    %c0_11 = arith.constant 0 : index
    %c0_12 = arith.constant 0 : index
    %19 = vector.load %arg7[%c0_11, %c0_12] : memref<512x32xbf16, #tpu.memory_space<vmem>>, vector<512x32xbf16>
    %cst_13 = arith.constant dense<0.000000e+00> : vector<8x32xf32>
    %20 = tpu.matmul %18, %19, %cst_13 {dimension_numbers = #tpu.dot_dimension_numbers<[1], [0], [0], [1], [0, 0, 1, 1], [], []>} : vector<8x512xbf16>, vector<512x32xbf16>, vector<8x32xf32> -> vector<8x32xf32>
    %c0_14 = arith.constant 0 : index
    %c0_15 = arith.constant 0 : index
    %21 = vector.load %arg8[%c0_14, %c0_15] : memref<1x32xf32, #tpu.memory_space<vmem>>, vector<1x32xf32>
    %22 = vector.broadcast %21 : vector<1x32xf32> to vector<8x32xf32>
    %23 = arith.addf %20, %22 : vector<8x32xf32>
    %24 = vector.extract_strided_slice %23 {offsets = [0, 0], sizes = [8, 16], strides = [1, 1]} : vector<8x32xf32> to vector<8x16xf32>
    %25 = vector.extract_strided_slice %23 {offsets = [0, 16], sizes = [8, 16], strides = [1, 1]} : vector<8x32xf32> to vector<8x16xf32>
    %c0_16 = arith.constant 0 : index
    %c0_17 = arith.constant 0 : index
    %26 = vector.load %arg3[%c0_16, %c0_17] : memref<8x16xf32, #tpu.memory_space<vmem>>, vector<8x16xf32>
    %cst_18 = arith.constant 5.000000e-01 : f32
    %27 = vector.broadcast %cst_18 : f32 to vector<8x16xf32>
    %28 = arith.mulf %27, %25 : vector<8x16xf32>
    %29 = math.exp %28 : vector<8x16xf32>
    %30 = arith.mulf %26, %29 : vector<8x16xf32>
    %31 = arith.addf %24, %30 : vector<8x16xf32>
    %32 = arith.truncf %31 : vector<8x16xf32> to vector<8x16xbf16>
    %c0_19 = arith.constant 0 : index
    %c0_20 = arith.constant 0 : index
    %33 = vector.load %arg9[%c0_19, %c0_20] : memref<16x512xbf16, #tpu.memory_space<vmem>>, vector<16x512xbf16>
    %cst_21 = arith.constant dense<0.000000e+00> : vector<8x512xf32>
    %34 = tpu.matmul %32, %33, %cst_21 {dimension_numbers = #tpu.dot_dimension_numbers<[1], [0], [0], [1], [0, 0, 1, 1], [], []>} : vector<8x16xbf16>, vector<16x512xbf16>, vector<8x512xf32> -> vector<8x512xf32>
    %c0_22 = arith.constant 0 : index
    %c0_23 = arith.constant 0 : index
    %35 = vector.load %arg10[%c0_22, %c0_23] : memref<8x512xbf16, #tpu.memory_space<vmem>>, vector<8x512xbf16>
    %cst_24 = arith.constant dense<0.000000e+00> : vector<8x512xf32>
    %36 = tpu.matmul %6, %35, %cst_24 {dimension_numbers = #tpu.dot_dimension_numbers<[1], [0], [0], [1], [0, 0, 1, 1], [], []>} : vector<8x8xbf16>, vector<8x512xbf16>, vector<8x512xf32> -> vector<8x512xf32>
    %37 = arith.addf %34, %36 : vector<8x512xf32>
    %c0_25 = arith.constant 0 : index
    %c0_26 = arith.constant 0 : index
    %38 = vector.load %arg11[%c0_25, %c0_26] : memref<1x512xf32, #tpu.memory_space<vmem>>, vector<1x512xf32>
    %39 = vector.broadcast %38 : vector<1x512xf32> to vector<8x512xf32>
    %40 = arith.addf %37, %39 : vector<8x512xf32>
    %cst_27 = arith.constant 0.000000e+00 : f32
    %41 = vector.broadcast %cst_27 : f32 to vector<8x512xf32>
    %42 = arith.maximumf %40, %41 : vector<8x512xf32>
    %43 = arith.truncf %42 : vector<8x512xf32> to vector<8x512xbf16>
    %c0_28 = arith.constant 0 : index
    %c0_29 = arith.constant 0 : index
    %44 = vector.load %arg12[%c0_28, %c0_29] : memref<512x64xbf16, #tpu.memory_space<vmem>>, vector<512x64xbf16>
    %cst_30 = arith.constant dense<0.000000e+00> : vector<8x64xf32>
    %45 = tpu.matmul %43, %44, %cst_30 {dimension_numbers = #tpu.dot_dimension_numbers<[1], [0], [0], [1], [0, 0, 1, 1], [], []>} : vector<8x512xbf16>, vector<512x64xbf16>, vector<8x64xf32> -> vector<8x64xf32>
    %c0_31 = arith.constant 0 : index
    %c0_32 = arith.constant 0 : index
    %46 = vector.load %arg13[%c0_31, %c0_32] : memref<1x64xf32, #tpu.memory_space<vmem>>, vector<1x64xf32>
    %47 = vector.broadcast %46 : vector<1x64xf32> to vector<8x64xf32>
    %48 = arith.addf %45, %47 : vector<8x64xf32>
    %cst_33 = arith.constant 0.000000e+00 : f32
    %49 = vector.broadcast %cst_33 : f32 to vector<8x64xf32>
    %50 = arith.subf %49, %48 : vector<8x64xf32>
    %51 = math.exp %50 : vector<8x64xf32>
    %cst_34 = arith.constant 1.000000e+00 : f32
    %52 = vector.broadcast %cst_34 : f32 to vector<8x64xf32>
    %53 = arith.addf %52, %51 : vector<8x64xf32>
    %54 = tpu.reciprocal %53 {approx = true} : vector<8x64xf32> -> vector<8x64xf32>
    %c0_35 = arith.constant 0 : index
    %c0_36 = arith.constant 0 : index
    %55 = vector.load %arg14[%c0_35, %c0_36] : memref<8x64xf32, #tpu.memory_space<vmem>>, vector<8x64xf32>
    tpu.vector_store %arg14[%c0_35, %c0_36], %54 {strides = array<i32>} : memref<8x64xf32, #tpu.memory_space<vmem>>, vector<8x64xf32>,
    %c0_37 = arith.constant 0 : index
    %c0_38 = arith.constant 0 : index
    %56 = vector.load %arg15[%c0_37, %c0_38] : memref<8x32xf32, #tpu.memory_space<vmem>>, vector<8x32xf32>
    tpu.vector_store %arg15[%c0_37, %c0_38], %23 {strides = array<i32>} : memref<8x32xf32, #tpu.memory_space<vmem>>, vector<8x32xf32>,
    return
  }
  func.func @transform_0(%arg0: i32) -> (i32, i32) {
    %c0_i32 = arith.constant 0 : i32
    %c0_i32_0 = arith.constant 0 : i32
    return %arg0, %c0_i32 : i32, i32
  }
  func.func @transform_1(%arg0: i32) -> (i32, i32) {
    %c0_i32 = arith.constant 0 : i32
    %c0_i32_0 = arith.constant 0 : i32
    return %arg0, %c0_i32 : i32, i32
  }
  func.func @transform_2(%arg0: i32) -> (i32, i32) {
    %c0_i32 = arith.constant 0 : i32
    %c0_i32_0 = arith.constant 0 : i32
    return %arg0, %c0_i32 : i32, i32
  }
  func.func @transform_3(%arg0: i32) -> (i32, i32) {
    %c0_i32 = arith.constant 0 : i32
    %c0_i32_0 = arith.constant 0 : i32
    %c0_i32_1 = arith.constant 0 : i32
    return %c0_i32, %c0_i32_0 : i32, i32
  }
  func.func @transform_4(%arg0: i32) -> (i32, i32) {
    %c0_i32 = arith.constant 0 : i32
    %c0_i32_0 = arith.constant 0 : i32
    %c0_i32_1 = arith.constant 0 : i32
    return %c0_i32, %c0_i32_0 : i32, i32
  }
  func.func @transform_5(%arg0: i32) -> (i32, i32) {
    %c0_i32 = arith.constant 0 : i32
    %c0_i32_0 = arith.constant 0 : i32
    %c0_i32_1 = arith.constant 0 : i32
    return %c0_i32, %c0_i32_0 : i32, i32
  }
  func.func @transform_6(%arg0: i32) -> (i32, i32) {
    %c0_i32 = arith.constant 0 : i32
    %c0_i32_0 = arith.constant 0 : i32
    %c0_i32_1 = arith.constant 0 : i32
    return %c0_i32, %c0_i32_0 : i32, i32
  }
  func.func @transform_7(%arg0: i32) -> (i32, i32) {
    %c0_i32 = arith.constant 0 : i32
    %c0_i32_0 = arith.constant 0 : i32
    %c0_i32_1 = arith.constant 0 : i32
    return %c0_i32, %c0_i32_0 : i32, i32
  }
  func.func @transform_8(%arg0: i32) -> (i32, i32) {
    %c0_i32 = arith.constant 0 : i32
    %c0_i32_0 = arith.constant 0 : i32
    %c0_i32_1 = arith.constant 0 : i32
    return %c0_i32, %c0_i32_0 : i32, i32
  }
  func.func @transform_9(%arg0: i32) -> (i32, i32) {
    %c0_i32 = arith.constant 0 : i32
    %c0_i32_0 = arith.constant 0 : i32
    %c0_i32_1 = arith.constant 0 : i32
    return %c0_i32, %c0_i32_0 : i32, i32
  }
  func.func @transform_10(%arg0: i32) -> (i32, i32) {
    %c0_i32 = arith.constant 0 : i32
    %c0_i32_0 = arith.constant 0 : i32
    %c0_i32_1 = arith.constant 0 : i32
    return %c0_i32, %c0_i32_0 : i32, i32
  }
  func.func @transform_11(%arg0: i32) -> (i32, i32) {
    %c0_i32 = arith.constant 0 : i32
    %c0_i32_0 = arith.constant 0 : i32
    %c0_i32_1 = arith.constant 0 : i32
    return %c0_i32, %c0_i32_0 : i32, i32
  }
  func.func @transform_12(%arg0: i32) -> (i32, i32) {
    %c0_i32 = arith.constant 0 : i32
    %c0_i32_0 = arith.constant 0 : i32
    %c0_i32_1 = arith.constant 0 : i32
    return %c0_i32, %c0_i32_0 : i32, i32
  }
  func.func @transform_13(%arg0: i32) -> (i32, i32) {
    %c0_i32 = arith.constant 0 : i32
    %c0_i32_0 = arith.constant 0 : i32
    return %arg0, %c0_i32 : i32, i32
  }
  func.func @transform_14(%arg0: i32) -> (i32, i32) {
    %c0_i32 = arith.constant 0 : i32
    %c0_i32_0 = arith.constant 0 : i32
    return %arg0, %c0_i32 : i32, i32
  }
}

</mosaic_0001>

<bundles_post_ra>
// kernel: cvae_forward.1
= control target key start
LH: loop header
LB: loop body
LE: loop exit
PB: predicated region body
PF: predicated region fallthrough
CT: control target
= control target key end

     0   :  { %v1655_v0 = vmov 0   ;;  %vm90_vm0 = vcmask 1043456   ;;  %v47_v12 = vlaneseq  ;;  %v1656_v15 = vmov 0.0   ;;  %s1657_s17 = smov 112   ;;  %s2090_s1 = inlined_call_operand.vmem [shape: s32[8,1], index: 1, kind: input, shape index: {}]   ;;  %s2091_s4 = inlined_call_operand.vmem [shape: bf16[8,512], index: 4, kind: input, shape index: {}]   ;;  %s2092_s3 = inlined_call_operand.vmem [shape: bf16[64,512], index: 3, kind: input, shape index: {}]   ;;  %s2093_s6 = inlined_call_operand.vmem [shape: bf16[512,32], index: 6, kind: input, shape index: {}]   ;;  %s2094_s0 = inlined_call_operand.vmem [shape: bf16[8,64], index: 0, kind: input, shape index: {}]   ;;  %s2095_s9 = inlined_call_operand.vmem [shape: bf16[8,512], index: 9, kind: input, shape index: {}]   ;;  %s2096_s5 = inlined_call_operand.vmem [shape: f32[1,512], index: 5, kind: input, shape index: {}]   ;;  %s2097_s8 = inlined_call_operand.vmem [shape: bf16[16,512], index: 8, kind: input, shape index: {}]   ;;  %s2098_s7 = inlined_call_operand.vmem [shape: f32[1,32], index: 7, kind: input, shape index: {}]   ;;  %s2099_s14 = inlined_call_operand.vmem [shape: f32[8,32], index: 14, kind: output, shape index: {1}]   ;;  %s2100_s11 = inlined_call_operand.vmem [shape: bf16[512,64], index: 11, kind: input, shape index: {}]   ;;  %s2101_s2 = inlined_call_operand.vmem [shape: f32[8,16], index: 2, kind: input, shape index: {}]   ;;  %s2102_s10 = inlined_call_operand.vmem [shape: f32[1,512], index: 10, kind: input, shape index: {}]   ;;  %s2103_s12 = inlined_call_operand.vmem [shape: f32[1,64], index: 12, kind: input, shape index: {}]   ;;  %s2104_s13 = inlined_call_operand.vmem [shape: f32[8,64], index: 13, kind: output, shape index: {0}]  }
   0x1   :  { %1546 = vset.pattern.permute.xlu0 %v1655_v0  ;;  %v49_v1 = vld [vmem:[%s2090_s1] sm:$0xff]  ;;  %v75_v3 = vld [vmem:[%s2091_s4 + $0x8] sm:$0xff]  ;;  %135 = vmatprep.mubr.bf16.mxu0 %v1655_v0  ;;  %vm86_vm2 = vcmask 64512   ;;  %vm265_vm3 = vcmask 523264   ;;  %v1583_v41 = vld [vmem:[%s2093_s6 + $0x50] sm:$0xff]   ;;  %vm1338_vm4 = vcmask 261120  }
   0x2   :  { %v74_v2 = vld [vmem:[%s2091_s4] sm:$0xff]  ;;  %51 = vperm.xlu0 %1546, %v49_v1   ;;  %v1352_v5 = vcombine.high %v75_v3, %v75_v3  ;;  %176 = vmatprep.mubr.bf16.mxu1 %v1655_v0  ;;  %v1351_v7 = vcombine.low %v75_v3, %v75_v3  ;;  %v1556_v11 = vld [vmem:[%s2092_s3 + $0xc] ss:$16 sps:$4 sm:$0xff]   ;;  %v48_v13 = vand.u32 127, %v47_v12  ;;  %v1554_v18 = vld [vmem:[%s2092_s3 + $0x8] ss:$16 sps:$4 sm:$0xff]  }
   0x3   :  { %v1350_v4 = vcombine.high %v74_v2, %v74_v2  ;;  %v1349_v6 = vcombine.low %v74_v2, %v74_v2  ;;  %v1553_v8 = vld [vmem:[%s2092_s3 + $0x4] ss:$16 sps:$4 sm:$0xff]   ;;  %v1551_v17 = vld [vmem:[%s2092_s3] ss:$16 sps:$4 sm:$0xff]   ;;  %v1562_v21 = vld [vmem:[%s2092_s3 + $0x2c] ss:$16 sps:$4 sm:$0xff]  }
   0x4   :  { %1355 = vmatprep.subr.msk.bf16.mxu1 %vm90_vm0, %v1352_v5  ;;  %v98_v10 = vsel %vm90_vm0, %v1351_v7, 0  ;;  %v1559_v20 = vld [vmem:[%s2092_s3 + $0x24] ss:$16 sps:$4 sm:$0xff]   ;;  %v1557_v22 = vld [vmem:[%s2092_s3 + $0x20] ss:$16 sps:$4 sm:$0xff]   ;;  %v1579_v37 = vld [vmem:[%s2093_s6 + $0x48] sm:$0xff]  }
   0x5   :  { %1353 = vmatprep.subr.msk.bf16.mxu0 %vm90_vm0, %v1350_v4  ;;  %v92_v9 = vsel %vm90_vm0, %v1349_v6, 0  ;;  %145 = vmatpush1.bf16.msra.mxu1 %v98_v10  ;;  %v1560_v23 = vld [vmem:[%s2092_s3 + $0x28] ss:$16 sps:$4 sm:$0xff]   ;;  %v1565_v24 = vld [vmem:[%s2092_s3 + $0x44] ss:$16 sps:$4 sm:$0xff]   ;;  %vm869_vm5 = vcmask 130048  }
   0x6   :  { %104 = vmatpush1.bf16.msra.mxu0 %v92_v9  ;;  %310 = vmatprep.subr.bf16.mxu1 %v1556_v11  ;;  %v1568_v25 = vld [vmem:[%s2092_s3 + $0x4c] ss:$16 sps:$4 sm:$0xff]   ;;  %v1563_v26 = vld [vmem:[%s2092_s3 + $0x40] ss:$16 sps:$4 sm:$0xff]   ;;  %v1566_v27 = vld [vmem:[%s2092_s3 + $0x48] ss:$16 sps:$4 sm:$0xff]  }
   0x7   :  { %269 = vmatprep.subr.bf16.mxu0 %v1553_v8  ;;  %v1571_v28 = vld [vmem:[%s2092_s3 + $0x64] ss:$16 sps:$4 sm:$0xff]   ;;  %v1574_v29 = vld [vmem:[%s2092_s3 + $0x6c] ss:$16 sps:$4 sm:$0xff]   ;;  %v1569_v30 = vld [vmem:[%s2092_s3 + $0x60] ss:$16 sps:$4 sm:$0xff]  }
   0x8   :  { %v1572_v31 = vld [vmem:[%s2092_s3 + $0x68] ss:$16 sps:$4 sm:$0xff]   ;;  %v1575_v32 = vld [vmem:[%s2093_s6 + $0x40] sm:$0xff]   ;;  %v1584_v42 = vld [vmem:[%s2093_s6 + $0xd0] sm:$0xff]  }
   0x9   :  { %v1576_v33 = vld [vmem:[%s2093_s6 + $0xc0] sm:$0xff]   ;;  %v1580_v38 = vld [vmem:[%s2093_s6 + $0xc8] sm:$0xff]   ;;  %v1585_v43 = vld [vmem:[%s2093_s6 + $0x10] sm:$0xff]  }
   0xa   :  { %v57_v34 = vld [vmem:[%s2094_s0] sm:$0xf]  ;;  %v1581_v39 = vld [vmem:[%s2093_s6 + $0x8] sm:$0xff]   ;;  %v1586_v44 = vld [vmem:[%s2093_s6 + $0x90] sm:$0xff]  }
   0xb   :  { %v1577_v35 = vld [vmem:[%s2093_s6] sm:$0xff]   ;;  %v1582_v40 = vld [vmem:[%s2093_s6 + $0x88] sm:$0xff]   ;;  %v1587_v45 = vld [vmem:[%s2093_s6 + $0x58] sm:$0xff]  }
   0xc   :  { %v1578_v36 = vld [vmem:[%s2093_s6 + $0x80] sm:$0xff]   ;;  %v1588_v46 = vld [vmem:[%s2093_s6 + $0xd8] sm:$0xff]   ;;  %v1595_v53 = vld [vmem:[%s2093_s6 + $0x68] sm:$0xff]  }
   0xd   :  { %v1589_v47 = vld [vmem:[%s2093_s6 + $0x18] sm:$0xff]   ;;  %v1591_v49 = vld [vmem:[%s2093_s6 + $0x60] sm:$0xff]   ;;  %v1596_v54 = vld [vmem:[%s2093_s6 + $0xe8] sm:$0xff]  }
   0xe   :  { %v1590_v48 = vld [vmem:[%s2093_s6 + $0x98] sm:$0xff]   ;;  %v1592_v50 = vld [vmem:[%s2093_s6 + $0xe0] sm:$0xff]   ;;  %v1597_v55 = vld [vmem:[%s2093_s6 + $0x28] sm:$0xff]  }
   0xf   :  { %v1593_v51 = vld [vmem:[%s2093_s6 + $0x20] sm:$0xff]   ;;  %v1598_v56 = vld [vmem:[%s2093_s6 + $0xa8] sm:$0xff]   ;;  %v1599_v57 = vld [vmem:[%s2093_s6 + $0x70] sm:$0xff]  }
  0x10   :  { %v1594_v52 = vld [vmem:[%s2093_s6 + $0xa0] sm:$0xff]   ;;  %v1600_v58 = vld [vmem:[%s2093_s6 + $0xf0] sm:$0xff]   ;;  %v1603_v61 = vld [vmem:[%s2093_s6 + $0x78] sm:$0xff]  }
  0x11   :  { %v1601_v59 = vld [vmem:[%s2093_s6 + $0x30] sm:$0xff]   ;;  %v1604_v62 = vld [vmem:[%s2093_s6 + $0xf8] sm:$0xff]   ;;  %v743_v2 = vld [vmem:[%s2095_s9] sm:$0xff] }
  0x12   :  { %v1602_v60 = vld [vmem:[%s2093_s6 + $0xb0] sm:$0xff]   ;;  %v1605_v63 = vld [vmem:[%s2093_s6 + $0x38] sm:$0xff]   ;;  %v744_v3 = vld [vmem:[%s2095_s9 + $0x8] sm:$0xff]  ;;  %v1409_v4 = vcombine.high %v743_v2, %v743_v2 }
  0x13   :  { %v1606_v1 = vld [vmem:[%s2093_s6 + $0xb8] sm:$0xff]   ;;  %v1411_v5 = vcombine.high %v744_v3, %v744_v3 }
  0x81   :  { %v52_v14 = vpop.permute.xlu0 %51 }
  0x82   :  { %vm53_vm1 = vcmp.eq.s32.totalorder %v48_v13, %v52_v14 }
  0x83   :  { %v1348_v16 = vsel %vm53_vm1, 1.0, %v1656_v15  ;;  %v1916_v15 = vshrl.u32 %v47_v12, 7 }
  0x84   :  { %v1762_v19 = vpack.c.bf16 %v1348_v16, %v1348_v16 }
  0x85   :  { %v355_v16 = vsub.s32 0, %v1916_v15 }
  0x86   :  { %1354 = vmatmul.mubr.msk.bf16.vlgmr.msra.gmra.mrb[0].mxu0 %vm86_vm2, %v1762_v19  ;;  %1356 = vmatmul.mubr.msk.bf16.vlgmr.msra.gmra.mrb[0].mxu1 %vm86_vm2, %v1762_v19 }
  0x87   :  { %270 = vmatpush1.bf16.msra.mxu0 %v1551_v17  ;;  %311 = vmatpush1.bf16.msra.mxu1 %v1554_v18  ;;  %v363_v17 = vsub.s32 2, %v1916_v15  ;;  %v351_v18 = vld [vmem:[%s2096_s5] sm:$0xf] }
  0x88   :  { %271 = vmatprep.subr.bf16.mxu0 %v1559_v20  ;;  %312 = vmatprep.subr.bf16.mxu1 %v1562_v21  ;;  %v359_v20 = vsub.s32 1, %v1916_v15  ;;  %v367_v21 = vsub.s32 3, %v1916_v15 }
  0x89   :  { %301 = vmatprep.mubr.bf16.mxu0 %v1655_v0  ;;  %342 = vmatprep.mubr.bf16.mxu1 %v1655_v0 }
  0x8b   :  { %272 = vmatpush1.bf16.msra.mxu0 %v1557_v22  ;;  %313 = vmatpush1.bf16.msra.mxu1 %v1560_v23  ;;  %v356_v22 = vrot.slane %v351_v18, %v355_v16  ;;  %v364_v23 = vrot.slane %v351_v18, %v363_v17 }
  0x8c   :  { %273 = vmatprep.subr.bf16.mxu0 %v1565_v24  ;;  %314 = vmatprep.subr.bf16.mxu1 %v1568_v25  ;;  %v360_v25 = vrot.slane %v351_v18, %v359_v20 }
  0x8f   :  { %274 = vmatpush1.bf16.msra.mxu0 %v1563_v26  ;;  %315 = vmatpush1.bf16.msra.mxu1 %v1566_v27  ;;  %v368_v26 = vrot.slane %v351_v18, %v367_v21 }
  0x90   :  { %275 = vmatprep.subr.bf16.mxu0 %v1571_v28  ;;  %316 = vmatprep.subr.bf16.mxu1 %v1574_v29 }
  0x93   :  { %276 = vmatpush1.bf16.msra.mxu0 %v1569_v30  ;;  %317 = vmatpush1.bf16.msra.mxu1 %v1572_v31 }
  0x94   :  { %1455 = vmatprep.subr.bf16.mxu0 %v1575_v32  ;;  %1477 = vmatprep.subr.bf16.mxu1 %v1576_v33 }
  0x96   :  { %1373 = vmatmul.mubr.msk.bf16.vlgmr.msra.gmra.mrb[4].mxu0 %vm265_vm3, %v57_v34  ;;  %1374 = vmatmul.mubr.msk.bf16.vlgmr.msra.gmra.mrb[4].mxu1 %vm265_vm3, %v57_v34 }
  0x97   :  { %1456 = vmatpush3.bf16.msra.mxu0 %v1577_v35  ;;  %1478 = vmatpush3.bf16.msra.mxu1 %v1578_v36 }
  0x98   :  { %1457 = vmatprep.subr.bf16.mxu0 %v1579_v37  ;;  %1479 = vmatprep.subr.bf16.mxu1 %v1580_v38 }
  0x9b   :  { %1458 = vmatpush3.bf16.msra.mxu0 %v1581_v39  ;;  %1480 = vmatpush3.bf16.msra.mxu1 %v1582_v40 }
  0x9c   :  { %1459 = vmatprep.subr.bf16.mxu0 %v1583_v41  ;;  %1481 = vmatprep.subr.bf16.mxu1 %v1584_v42 }
  0x9f   :  { %1460 = vmatpush3.bf16.msra.mxu0 %v1585_v43  ;;  %1482 = vmatpush3.bf16.msra.mxu1 %v1586_v44  ;;  %v1408_v43 = vcombine.low %v743_v2, %v743_v2  ;;  %v1410_v44 = vcombine.low %v744_v3, %v744_v3 }
  0xa0   :  { %1461 = vmatprep.subr.bf16.mxu0 %v1587_v45  ;;  %1483 = vmatprep.subr.bf16.mxu1 %v1588_v46 }
  0xa3   :  { %1462 = vmatpush3.bf16.msra.mxu0 %v1589_v47  ;;  %1484 = vmatpush3.bf16.msra.mxu1 %v1590_v48 }
  0xa4   :  { %1463 = vmatprep.subr.bf16.mxu0 %v1591_v49  ;;  %1485 = vmatprep.subr.bf16.mxu1 %v1592_v50 }
  0xa7   :  { %1464 = vmatpush3.bf16.msra.mxu0 %v1593_v51  ;;  %1486 = vmatpush3.bf16.msra.mxu1 %v1594_v52  ;;  %v756_v51 = vsel %vm90_vm0, %v1408_v43, 0  ;;  %v762_v52 = vsel %vm90_vm0, %v1410_v44, 0  ;;  %v1633_v43 = vld [vmem:[%s2100_s11 + $0x60] sm:$0xff]  }
  0xa8   :  { %1465 = vmatprep.subr.bf16.mxu0 %v1595_v53  ;;  %1487 = vmatprep.subr.bf16.mxu1 %v1596_v54  ;;  %v1611_v53 = vld [vmem:[%s2097_s8] ss:$16 sps:$4 sm:$0xff]   ;;  %v1613_v54 = vld [vmem:[%s2097_s8 + $0x4] ss:$16 sps:$4 sm:$0xff]  }
  0xa9   :  { %v1634_v44 = vld [vmem:[%s2100_s11 + $0xe0] sm:$0xff]  }
  0xab   :  { %1466 = vmatpush3.bf16.msra.mxu0 %v1597_v55  ;;  %1488 = vmatpush3.bf16.msra.mxu1 %v1598_v56  ;;  %v1614_v55 = vld [vmem:[%s2097_s8 + $0x8] ss:$16 sps:$4 sm:$0xff]  }
  0xac   :  { %1467 = vmatprep.subr.bf16.mxu0 %v1599_v57  ;;  %1489 = vmatprep.subr.bf16.mxu1 %v1600_v58  ;;  %v1375_v57 = vld [vmem:[%s2098_s7] ss:$0 sm:$0xff] }
  0xaf   :  { %1468 = vmatpush3.bf16.msra.mxu0 %v1601_v59  ;;  %1490 = vmatpush3.bf16.msra.mxu1 %v1602_v60 }
  0xb0   :  { %1469 = vmatprep.subr.bf16.mxu0 %v1603_v61  ;;  %1491 = vmatprep.subr.bf16.mxu1 %v1604_v62 }
  0xb3   :  { %1470 = vmatpush3.bf16.msra.mxu0 %v1605_v63  ;;  %1492 = vmatpush3.bf16.msra.mxu1 %v1606_v1 }
  0xb4   :  { %1412 = vmatprep.subr.msk.bf16.mxu0 %vm90_vm0, %v1409_v4  ;;  %1414 = vmatprep.subr.msk.bf16.mxu1 %vm90_vm0, %v1411_v5 }
 0x159   :  { %v137_v6 = vpop.f32.mrb[0].mxu0  ;;  %v178_v7 = vpop.f32.mrb[0].mxu1 }
 0x15a   :  { %v139_v8 = vpop.f32.mrb[1].mxu0  ;;  %v180_v9 = vpop.f32.mrb[1].mxu1 }
 0x15b   :  { %v141_v10 = vpop.f32.mrb[2].mxu0  ;;  %v182_v11 = vpop.f32.mrb[2].mxu1 }
 0x15c   :  { %v142_v13 = vpop.f32.mrb[3].mxu0  ;;  %v183_v14 = vpop.f32.mrb[3].mxu1 }
 0x169   :  { %v303_v12 = vpop.f32.mrb[4].mxu0  ;;  %v344_v24 = vpop.f32.mrb[4].mxu1 }
 0x16a   :  { %v304_v27 = vadd.f32 %v303_v12, %v137_v6  ;;  %v345_v28 = vadd.f32 %v344_v24, %v178_v7  ;;  %v305_v29 = vpop.f32.mrb[5].mxu0  ;;  %v346_v30 = vpop.f32.mrb[5].mxu1  ;;  %v728_v24 = vld [vmem:[%s2101_s2] sm:$0xff] }
 0x16b   :  { %v306_v31 = vadd.f32 %v305_v29, %v139_v8  ;;  %v347_v32 = vadd.f32 %v346_v30, %v180_v9  ;;  %v307_v33 = vpop.f32.mrb[6].mxu0  ;;  %v348_v34 = vpop.f32.mrb[6].mxu1  ;;  %v1620_v29 = vld [vmem:[%s2100_s11 + $0x80] sm:$0xff]  }
 0x16c   :  { %v373_v35 = vadd.f32 %v356_v22, %v304_v27  ;;  %v375_v36 = vadd.f32 %v364_v23, %v345_v28  ;;  %v308_v37 = vpop.f32.mrb[7].mxu0  ;;  %v349_v38 = vpop.f32.mrb[7].mxu1  ;;  %v1617_v22 = vld [vmem:[%s2100_s11 + $0x40] sm:$0xff]   ;;  %v1623_v33 = vld [vmem:[%s2100_s11 + $0x8] sm:$0xff]  }
 0x16d   :  { %v374_v39 = vadd.f32 %v360_v25, %v306_v31  ;;  %v376_v40 = vadd.f32 %v368_v26, %v347_v32  ;;  %v1618_v23 = vld [vmem:[%s2100_s11 + $0xc0] sm:$0xff]   ;;  %v1621_v31 = vld [vmem:[%s2100_s11 + $0x48] sm:$0xff]   ;;  %v1627_v37 = vld [vmem:[%s2100_s11 + $0x10] sm:$0xff]  }
 0x16e   :  { %v377_v41 = vmax.f32 %v373_v35, 0.0  ;;  %v379_v42 = vmax.f32 %v375_v36, 0.0  ;;  %v1619_v28 = vld [vmem:[%s2100_s11] sm:$0xff]   ;;  %v1622_v32 = vld [vmem:[%s2100_s11 + $0xc8] sm:$0xff]   ;;  %v1625_v35 = vld [vmem:[%s2100_s11 + $0x50] sm:$0xff]  }
 0x16f   :  { %v378_v45 = vmax.f32 %v374_v39, 0.0  ;;  %v380_v46 = vmax.f32 %v376_v40, 0.0  ;;  %v1624_v34 = vld [vmem:[%s2100_s11 + $0x88] sm:$0xff]   ;;  %v1626_v36 = vld [vmem:[%s2100_s11 + $0xd0] sm:$0xff]   ;;  %v1629_v39 = vld [vmem:[%s2100_s11 + $0x58] sm:$0xff]  }
 0x170   :  { %v381_v49 = vpack.c.bf16 %v377_v41, %v377_v41  ;;  %v383_v50 = vpack.c.bf16 %v379_v42, %v379_v42  ;;  %v1628_v38 = vld [vmem:[%s2100_s11 + $0x90] sm:$0xff]   ;;  %v1630_v40 = vld [vmem:[%s2100_s11 + $0xd8] sm:$0xff]  }
 0x171   :  { %v382_v47 = vpack.c.bf16 %v378_v45, %v378_v45  ;;  %v384_v48 = vpack.c.bf16 %v380_v46, %v380_v46  ;;  %v1631_v41 = vld [vmem:[%s2100_s11 + $0x18] sm:$0xff]   ;;  %v1635_v45 = vld [vmem:[%s2100_s11 + $0x20] sm:$0xff]  }
 0x172   :  { %v1632_v42 = vld [vmem:[%s2100_s11 + $0x98] sm:$0xff]   ;;  %v1636_v46 = vld [vmem:[%s2100_s11 + $0xa0] sm:$0xff]  }
 0x173   :  { %680 = vmatprep.mubr.bf16.mxu0 %v382_v47  ;;  %720 = vmatprep.mubr.bf16.mxu1 %v384_v48  ;;  %v1637_v47 = vld [vmem:[%s2100_s11 + $0x68] sm:$0xff]  }
 0x174   :  { %681 = vmatmul.mubr.bf16.vlgmr.msra.gmra.mrb[8].mxu0 %v381_v49  ;;  %721 = vmatmul.mubr.bf16.vlgmr.msra.gmra.mrb[8].mxu1 %v383_v50  ;;  %v1638_v48 = vld [vmem:[%s2100_s11 + $0xe8] sm:$0xff]  }
 0x175   :  { %768 = vmatpush1.bf16.msra.mxu0 %v756_v51  ;;  %809 = vmatpush1.bf16.msra.mxu1 %v762_v52  ;;  %v1639_v49 = vld [vmem:[%s2100_s11 + $0x28] sm:$0xff]   ;;  %v1641_v51 = vld [vmem:[%s2100_s11 + $0x70] sm:$0xff]  }
 0x176   :  { %799 = vmatprep.mubr.bf16.mxu0 %v1655_v0  ;;  %840 = vmatprep.mubr.bf16.mxu1 %v1655_v0  ;;  %v1640_v50 = vld [vmem:[%s2100_s11 + $0xa8] sm:$0xff]   ;;  %v1642_v52 = vld [vmem:[%s2100_s11 + $0xf0] sm:$0xff]  }
 0x177   :  { %873 = vmatprep.subr.bf16.mxu0 %v1613_v54  ;;  %v1644_v54 = vld [vmem:[%s2100_s11 + $0xb0] sm:$0xff]  }
 0x17c   :  { %1413 = vmatmul.mubr.msk.bf16.vlgmr.msra.gmra.mrb[12].mxu0 %vm86_vm2, %v1762_v19  ;;  %1415 = vmatmul.mubr.msk.bf16.vlgmr.msra.gmra.mrb[12].mxu1 %vm86_vm2, %v1762_v19  ;;  %v1616_v19 = vld [vmem:[%s2097_s8 + $0xc] ss:$16 sps:$4 sm:$0xff]  }
 0x17d   :  { %905 = vmatprep.mubr.bf16.mxu0 %v1655_v0  ;;  %946 = vmatprep.mubr.bf16.mxu1 %v1655_v0 }
 0x17e   :  { %874 = vmatpush1.bf16.msra.mxu0 %v1611_v53  ;;  %914 = vmatprep.subr.bf16.mxu1 %v1616_v19  ;;  %v1643_v53 = vld [vmem:[%s2100_s11 + $0x30] sm:$0xff]   ;;  %v1646_v19 = vld [vmem:[%s2100_s11 + $0xf8] sm:$0xff]  }
 0x17f   :  { %915 = vmatpush1.bf16.msra.mxu1 %v1614_v55  ;;  %1499 = vmatprep.subr.bf16.mxu0 %v1617_v22  ;;  %v1645_v55 = vld [vmem:[%s2100_s11 + $0x78] sm:$0xff]  }
 0x180   :  { %1521 = vmatprep.subr.bf16.mxu1 %v1618_v23 }
 0x247   :  { %v1471_v0 = vpop.f32.mrb[8].mxu0  ;;  %v1493_v56 = vpop.f32.mrb[8].mxu1 }
 0x248   :  { %v1472_v58 = vpop.f32.mrb[9].mxu0  ;;  %v1494_v59 = vpop.f32.mrb[9].mxu1 }
 0x249   :  { %v1473_v60 = vadd.f32 %v1472_v58, %v1471_v0  ;;  %v1495_v61 = vadd.f32 %v1494_v59, %v1493_v56  ;;  %v1474_v62 = vpop.f32.mrb[10].mxu0  ;;  %v1496_v63 = vpop.f32.mrb[10].mxu1  ;;  %v1647_v0 = vld [vmem:[%s2100_s11 + $0x38] sm:$0xff]  }
 0x24a   :  { %v1475_v1 = vpop.f32.mrb[11].mxu0  ;;  %v1497_v2 = vpop.f32.mrb[11].mxu1  ;;  %v1648_v56 = vld [vmem:[%s2100_s11 + $0xb8] sm:$0xff]  }
 0x24b   :  { %v683_v3 = vadd.f32 %v1473_v60, %v1375_v57  ;;  %v955_v57 = vld [vmem:[%s2102_s10] sm:$0xf] }
 0x24c   :  { %v960_v58 = vrot.slane %v955_v57, %v355_v16  ;;  %v968_v59 = vrot.slane %v955_v57, %v363_v17  ;;  %v964_v62 = vrot.slane %v955_v57, %v359_v20  ;;  %v972_v63 = vrot.slane %v955_v57, %v367_v21 }
 0x24d   :  { %v723_v4 = vadd.f32 %v1495_v61, %v683_v3 }
 0x24f   :  { %v729_v5 = vmul.f32 0.5, %v723_v4  ;;  %1339 = vst.msk [vmem:[%s2099_s14] sm:$0xff] %vm1338_vm4, %v723_v4  ;;  %v1961_v6 = vpop.f32.mrb[12].mxu0  ;;  %v1963_v7 = vpop.f32.mrb[12].mxu1 }
 0x250   :  { %v1965_v8 = vpop.f32.mrb[13].mxu0  ;;  %v1967_v9 = vpop.f32.mrb[13].mxu1 }
 0x251   :  { %v730_v10 = vmul.f32 1.442695, %v729_v5  ;;  %v805_v11 = vpop.f32.mrb[14].mxu0  ;;  %v846_v13 = vpop.f32.mrb[14].mxu1 }
 0x252   :  { %v806_v14 = vpop.f32.mrb[15].mxu0  ;;  %v847_v18 = vpop.f32.mrb[15].mxu1 }
 0x253   :  { %1649 = vpow2.f32 %v730_v10 }
 0x25d   :  { %v1650_v12 = vpop.eup %1649 }
 0x25e   :  { %733 = vrot.lane.b32.xlu0 %v1650_v12, %s1657_s17 }
 0x2d0   :  { %v734_v25 = vpop.permute.xlu0 %733 }
 0x2d1   :  { %v736_v26 = vmul.f32 %v734_v25, %v728_v24 }
 0x2d3   :  { %v737_v27 = vadd.f32 %v736_v26, %v723_v4  ;;  %v1422_v26 = vld [vmem:[%s2103_s12] ss:$0 sm:$0xff] }
 0x2d5   :  { %v738_v30 = vpack.c.bf16 %v737_v27, %v737_v27 }
 0x2d7   :  { %1420 = vmatmul.mubr.msk.bf16.vlgmr.msra.gmra.mrb[16].mxu0 %vm869_vm5, %v738_v30  ;;  %1421 = vmatmul.mubr.msk.bf16.vlgmr.msra.gmra.mrb[16].mxu1 %vm869_vm5, %v738_v30 }
 0x2d8   :  { %1500 = vmatpush3.bf16.msra.mxu0 %v1619_v28  ;;  %1522 = vmatpush3.bf16.msra.mxu1 %v1620_v29 }
 0x2d9   :  { %1501 = vmatprep.subr.bf16.mxu0 %v1621_v31  ;;  %1523 = vmatprep.subr.bf16.mxu1 %v1622_v32 }
 0x2dc   :  { %1502 = vmatpush3.bf16.msra.mxu0 %v1623_v33  ;;  %1524 = vmatpush3.bf16.msra.mxu1 %v1624_v34 }
 0x2dd   :  { %1503 = vmatprep.subr.bf16.mxu0 %v1625_v35  ;;  %1525 = vmatprep.subr.bf16.mxu1 %v1626_v36 }
 0x2e0   :  { %1504 = vmatpush3.bf16.msra.mxu0 %v1627_v37  ;;  %1526 = vmatpush3.bf16.msra.mxu1 %v1628_v38 }
 0x2e1   :  { %1505 = vmatprep.subr.bf16.mxu0 %v1629_v39  ;;  %1527 = vmatprep.subr.bf16.mxu1 %v1630_v40 }
 0x2e4   :  { %1506 = vmatpush3.bf16.msra.mxu0 %v1631_v41  ;;  %1528 = vmatpush3.bf16.msra.mxu1 %v1632_v42 }
 0x2e5   :  { %1507 = vmatprep.subr.bf16.mxu0 %v1633_v43  ;;  %1529 = vmatprep.subr.bf16.mxu1 %v1634_v44 }
 0x2e8   :  { %1508 = vmatpush3.bf16.msra.mxu0 %v1635_v45  ;;  %1530 = vmatpush3.bf16.msra.mxu1 %v1636_v46 }
 0x2e9   :  { %1509 = vmatprep.subr.bf16.mxu0 %v1637_v47  ;;  %1531 = vmatprep.subr.bf16.mxu1 %v1638_v48 }
 0x2ec   :  { %1510 = vmatpush3.bf16.msra.mxu0 %v1639_v49  ;;  %1532 = vmatpush3.bf16.msra.mxu1 %v1640_v50 }
 0x2ed   :  { %1511 = vmatprep.subr.bf16.mxu0 %v1641_v51  ;;  %1533 = vmatprep.subr.bf16.mxu1 %v1642_v52 }
 0x2f0   :  { %1512 = vmatpush3.bf16.msra.mxu0 %v1643_v53  ;;  %1534 = vmatpush3.bf16.msra.mxu1 %v1644_v54 }
 0x2f1   :  { %1513 = vmatprep.subr.bf16.mxu0 %v1645_v55  ;;  %1535 = vmatprep.subr.bf16.mxu1 %v1646_v19 }
 0x2f4   :  { %1514 = vmatpush3.bf16.msra.mxu0 %v1647_v0  ;;  %1536 = vmatpush3.bf16.msra.mxu1 %v1648_v56 }
 0x3aa   :  { %v907_v60 = vpop.f32.mrb[16].mxu0  ;;  %v948_v61 = vpop.f32.mrb[16].mxu1 }
 0x3ab   :  { %v908_v1 = vadd.f32 %v907_v60, %v1961_v6  ;;  %v949_v2 = vadd.f32 %v948_v61, %v1963_v7  ;;  %v909_v3 = vpop.f32.mrb[17].mxu0  ;;  %v950_v4 = vpop.f32.mrb[17].mxu1 }
 0x3ac   :  { %v910_v5 = vadd.f32 %v909_v3, %v1965_v8  ;;  %v951_v16 = vadd.f32 %v950_v4, %v1967_v9  ;;  %v911_v10 = vpop.f32.mrb[18].mxu0  ;;  %v952_v17 = vpop.f32.mrb[18].mxu1 }
 0x3ad   :  { %v977_v11 = vadd.f32 %v960_v58, %v908_v1  ;;  %v979_v13 = vadd.f32 %v968_v59, %v949_v2  ;;  %v912_v14 = vpop.f32.mrb[19].mxu0  ;;  %v953_v18 = vpop.f32.mrb[19].mxu1 }
 0x3ae   :  { %v978_v20 = vadd.f32 %v964_v62, %v910_v5  ;;  %v980_v22 = vadd.f32 %v972_v63, %v951_v16 }
 0x3af   :  { %v981_v15 = vmax.f32 %v977_v11, 0.0  ;;  %v983_v21 = vmax.f32 %v979_v13, 0.0 }
 0x3b0   :  { %v982_v23 = vmax.f32 %v978_v20, 0.0  ;;  %v984_v6 = vmax.f32 %v980_v22, 0.0 }
 0x3b1   :  { %v985_v24 = vpack.c.bf16 %v981_v15, %v981_v15  ;;  %v987_v25 = vpack.c.bf16 %v983_v21, %v983_v21 }
 0x3b2   :  { %v986_v12 = vpack.c.bf16 %v982_v23, %v982_v23  ;;  %v988_v7 = vpack.c.bf16 %v984_v6, %v984_v6 }
 0x3b4   :  { %1284 = vmatprep.mubr.bf16.mxu0 %v986_v12  ;;  %1324 = vmatprep.mubr.bf16.mxu1 %v988_v7 }
 0x3b5   :  { %1285 = vmatmul.mubr.bf16.vlgmr.msra.gmra.mrb[20].mxu0 %v985_v24  ;;  %1325 = vmatmul.mubr.bf16.vlgmr.msra.gmra.mrb[20].mxu1 %v987_v25 }
 0x488   :  { %v1515_v8 = vpop.f32.mrb[20].mxu0  ;;  %v1537_v9 = vpop.f32.mrb[20].mxu1 }
 0x489   :  { %v1516_v27 = vpop.f32.mrb[21].mxu0  ;;  %v1538_v28 = vpop.f32.mrb[21].mxu1 }
 0x48a   :  { %v1517_v29 = vadd.f32 %v1516_v27, %v1515_v8  ;;  %v1539_v30 = vadd.f32 %v1538_v28, %v1537_v9  ;;  %v1518_v31 = vpop.f32.mrb[22].mxu0  ;;  %v1540_v32 = vpop.f32.mrb[22].mxu1 }
 0x48b   :  { %v1519_v33 = vpop.f32.mrb[23].mxu0  ;;  %v1541_v34 = vpop.f32.mrb[23].mxu1 }
 0x48c   :  { %v1287_v35 = vadd.f32 %v1517_v29, %v1422_v26 }
 0x48e   :  { %v1327_v36 = vadd.f32 %v1539_v30, %v1287_v35 }
 0x490   :  { %v1332_v37 = vsub.f32 0.0, %v1327_v36 }
 0x492   :  { %v1333_v38 = vmul.f32 1.442695, %v1332_v37 }
 0x494   :  { %1651 = vpow2.f32 %v1333_v38 }
 0x49e   :  { %v1652_v39 = vpop.eup %1651 }
 0x49f   :  { %v1335_v40 = vadd.f32 1.0, %v1652_v39 }
 0x4a1   :  { %1653 = vrcp.f32 %v1335_v40 }
 0x4ab   :  { %v1654_v41 = vpop.eup %1653 }
 0x4ac   :  { %1337 = vst.msk [vmem:[%s2104_s13] sm:$0xff] %vm265_vm3, %v1654_v41 }

</bundles_post_ra>
